<compile_context>
chip_gen: v7x
topology: tpu7x:2x2x1
jax: 0.10.0
libtpu: 0.0.40
codegen_flags: <defaults>
</compile_context>

<pallas_src>
import functools
import math

import jax
import jax.numpy as jnp
from jax.experimental import pallas as pl
from jax.experimental.pallas import tpu as pltpu

LN_EPS = 1e-5


# ---------------------------------------------------------------------------
# kernel
# ---------------------------------------------------------------------------
def _make_kernel(rows, c2, c4):
    """Kernel factory.  rows = tb*Wo output rows per grid step."""
    inv_n = 1.0 / float(c4)

    def kernel(x_ref, wt_ref, wb_ref, b_ref, o_ref):
        # x_ref : (tb, 2, Wo, 2C) native dtype   merged-patch input view
        # wt_ref: (2C, 2C_out)    MXU dtype      gamma-folded weight, h-even half
        # wb_ref: (2C, 2C_out)    MXU dtype      gamma-folded weight, h-odd  half
        # b_ref : (1, 2C_out)     f32            beta @ W
        # o_ref : (rows, 2C_out)  output dtype
        top = x_ref[:, 0, :, :].reshape(rows, c2)    # h-even rows: [x0 | x2]
        bot = x_ref[:, 1, :, :].reshape(rows, c2)    # h-odd  rows: [x1 | x3]

        tf = top.astype(jnp.float32)
        bf = bot.astype(jnp.float32)

        # Two-pass LayerNorm statistics in f32 over the full 4C channels
        # (biased variance, matching PyTorch; robust to mean >> std inputs).
        mean = (jnp.sum(tf, axis=-1, keepdims=True)
                + jnp.sum(bf, axis=-1, keepdims=True)) * inv_n
        td = tf - mean
        bd = bf - mean
        var = (jnp.sum(td * td, axis=-1, keepdims=True)
               + jnp.sum(bd * bd, axis=-1, keepdims=True)) * inv_n
        rstd = jax.lax.rsqrt(var + LN_EPS)

        # Standardize, feed the MXU in its configured dtype, accumulate in f32.
        mdt = wt_ref.dtype
        topn = (td * rstd).astype(mdt)
        botn = (bd * rstd).astype(mdt)
        acc = jnp.dot(topn, wt_ref[...], preferred_element_type=jnp.float32)
        acc = acc + jnp.dot(botn, wb_ref[...], preferred_element_type=jnp.float32)

        # bias' = beta @ W folded in after the matmul; store in caller dtype.
        o_ref[...] = (acc + b_ref[...]).astype(o_ref.dtype)

    return kernel


# ---------------------------------------------------------------------------
# hardware-aware helpers (all plain Python at trace time)
# ---------------------------------------------------------------------------
def _vmem_budget():
    """Return (scoped VMEM cap in bytes, default target output rows per step)."""
    kind = ""
    try:
        kind = jax.devices()[0].device_kind.lower()
    except Exception:
        pass
    cap = None
    try:
        cap = int(pltpu.get_tpu_info().vmem_capacity_bytes)
    except Exception:
        pass
    if ("v7" in kind) or (cap is not None and cap <= (80 << 20)):
        # v7x: 64 MiB per TensorCore -> leave headroom for Mosaic scratch.
        return 46 << 20, 512
    # v5e / v6e: 128 MiB -> bigger tiles, fewer grid steps.
    return 100 << 20, 1024


def _x_buffer_count():
    """Input-pipeline depth for the activation tile (3 on v5e, else 2)."""
    try:
        kind = jax.devices()[0].device_kind.lower()
    except Exception:
        return 2
    if "v5 lite" in kind or "v5e" in kind or "v5litepod" in kind:
        return 3          # slowest HBM generation: extra buffer hides DMA bubbles
    return 2


def _round_up(x, m):
    return ((x + m - 1) // m) * m


def _round_down_min(x, m):
    return max(m, (x // m) * m)


def _pick_tb(R, Wo, target_rows, max_tb_vmem):
    """Pick super-rows per grid step (cdiv grid, partial edge block allowed).

    Guarantees rows = tb*Wo is a multiple of 8 whenever grid > 1 (so the
    (rows, Cout) output block is a legal TPU block); otherwise falls back to a
    single full block (rows == M, always legal).  Prefers an even number of
    grid steps so v7x's 2 TensorCores stay balanced on the parallel axis.
    """
    g = 8 // math.gcd(Wo, 8)                       # tb granularity for 8-alignment
    tb_cap = _round_down_min(max(1, max_tb_vmem), g)
    tb = min(_round_down_min(max(1, target_rows // Wo), g), tb_cap)
    if tb >= R:
        if R < 2 * g:
            return R, 1                            # single full block
        tb = min(_round_up(int(pl.cdiv(R, 2)), g), tb_cap)  # keep >= 2 steps
        if tb >= R:
            return R, 1
    grid = int(pl.cdiv(R, tb))
    if grid > 1 and grid % 2 == 1:                 # prefer even step count (v7x 2 TCs)
        tb_e = min(_round_up(int(pl.cdiv(R, grid + 1)), g), tb_cap)
        if 0 < tb_e < R:
            grid_e = int(pl.cdiv(R, tb_e))
            if grid_e % 2 == 0:
                tb, grid = tb_e, grid_e
    return tb, grid


# ---------------------------------------------------------------------------
# wrapper
# ---------------------------------------------------------------------------
@functools.partial(jax.jit, static_argnames=("H", "W", "tm", "bf16_mxu"))
def patch_merging(x, H, W, w_red, gamma, beta, *, tm=None, bf16_mxu=False):
    """x: (B, L, C), L == H*W.  w_red: (4C, 2C) (transpose of nn.Linear.weight).

    Returns (B, ceil(H/2)*ceil(W/2), 2C) in x.dtype.
    """
    B, L, C = x.shape
    assert L == H * W, "input feature has wrong size"
    C2, C4 = 2 * C, 4 * C
    Cout = 2 * C

    # ---- pad odd spatial dims (same as F.pad in the PyTorch module) ----
    xv = x.reshape(B, H, W, C)
    pad_h, pad_w = H % 2, W % 2
    if pad_h or pad_w:
        xv = jnp.pad(xv, ((0, 0), (0, pad_h), (0, pad_w), (0, 0)))
    Hp, Wp = H + pad_h, W + pad_w
    Ho, Wo = Hp // 2, Wp // 2
    R = B * Ho          # "super-rows": one per output row of 2x2 patches
    M = R * Wo          # total output pixels

    # ---- free (layout-preserving) reshape: (B,Hp,Wp,C) -> (R, 2, Wo, 2C) ----
    # y[k, p, j, :] = concat(xv[b, 2i+p, 2j, :], xv[b, 2i+p, 2j+1, :]), k=b*Ho+i.
    y = xv.reshape(R, 2, Wo, C2)

    in_dt = x.dtype
    out_dt = x.dtype
    mxu_dt = (jnp.bfloat16
              if (in_dt == jnp.bfloat16 or bf16_mxu) else jnp.float32)

    # ---- fold LayerNorm affine into the reduction weight ----
    w32 = w_red.astype(jnp.float32)                       # (4C, 2C), in x out
    wg = gamma.astype(jnp.float32).reshape(C4, 1) * w32   # gamma-scaled rows
    # Permute rows from PyTorch concat order [x0, x1, x2, x3] to the fused
    # channel order [x0, x2 | x1, x3] produced by the reshape above.
    wg_f = jnp.concatenate(
        [wg[0:C], wg[2 * C:3 * C], wg[C:2 * C], wg[3 * C:4 * C]], axis=0)
    wt = wg_f[:C2].astype(mxu_dt)                         # h-even half
    wb = wg_f[C2:].astype(mxu_dt)                         # h-odd  half
    bias = (beta.astype(jnp.float32) @ w32).reshape(1, Cout)

    # ---- generation-aware VMEM accounting & tile selection ----
    limit_cap, target_default = _vmem_budget()
    target_rows = tm if tm is not None else target_default
    nx = _x_buffer_count()                                # x pipeline depth

    in_isz = jnp.dtype(in_dt).itemsize
    out_isz = jnp.dtype(out_dt).itemsize
    mxu_isz = jnp.dtype(mxu_dt).itemsize
    # Single-buffered constant operands (pl.Buffered(1) below).
    w_total = 2 * C2 * Cout * mxu_isz + Cout * 4
    # Per super-row bytes: pipelined activation tiles + in-kernel f32
    # intermediates (tf/bf/td/bd, acc) + MXU-dtype copies of the standardized
    # halves.
    act_in = 2 * Wo * C2 * in_isz
    act_out = Wo * Cout * out_isz
    f32_tmp = Wo * ((4 * C2 + Cout) * 4 + 2 * C2 * mxu_isz)
    per_superrow = nx * act_in + 2 * act_out + f32_tmp

    working_budget = limit_cap - (4 << 20)
    max_tb_vmem = max(1, (working_budget - w_total) // per_superrow)
    tb, n_steps = _pick_tb(R, Wo, target_rows, max_tb_vmem)
    rows = tb * Wo
    grid = (n_steps,)

    vmem_need = w_total + tb * per_superrow + (2 << 20)
    vmem_limit = int(min(max(32 << 20, vmem_need), limit_cap))

    # NOTE: for tiny C (demo C=4 -> Cout=8 < 128) the output store is a masked
    # partial vst; at production Swin widths (C >= 96, Cout >= 192) it is
    # lane-dense.  When Wo % 8 != 0 the in-kernel (tb,Wo,2C)->(rows,2C)
    # collapse is a relayout rather than a free view (perf only, not a
    # correctness issue; a single full block is used when R < 16/gcd(Wo,8)).
    kernel = _make_kernel(rows, C2, C4)
    out = pl.pallas_call(
        kernel,
        out_shape=jax.ShapeDtypeStruct((M, Cout), out_dt),
        grid_spec=pltpu.PrefetchScalarGridSpec(
            num_scalar_prefetch=0,
            grid=grid,
            in_specs=[
                pl.BlockSpec((tb, 2, Wo, C2), lambda i: (i, 0, 0, 0),
                             pipeline_mode=pl.Buffered(nx)),
                # Constant operands: single buffer (their block never changes).
                pl.BlockSpec((C2, Cout), lambda i: (0, 0),
                             pipeline_mode=pl.Buffered(1)),
                pl.BlockSpec((C2, Cout), lambda i: (0, 0),
                             pipeline_mode=pl.Buffered(1)),
                pl.BlockSpec((1, Cout), lambda i: (0, 0),
                             pipeline_mode=pl.Buffered(1)),
            ],
            out_specs=pl.BlockSpec((rows, Cout), lambda i: (i, 0)),
        ),
        compiler_params=pltpu.CompilerParams(
            dimension_semantics=("parallel",),
            vmem_limit_bytes=vmem_limit,
        ),
    )(y, wt, wb, bias)

    return out.reshape(B, Ho * Wo, Cout)


# ---------------------------------------------------------------------------
# pure-JAX reference mirroring the PyTorch forward
# ---------------------------------------------------------------------------
def _reference(x, H, W, w_red, gamma, beta):
    x = x.astype(jnp.float32)
    B, L, C = x.shape
    xv = x.reshape(B, H, W, C)
    pad_h, pad_w = H % 2, W % 2
    if pad_h or pad_w:
        xv = jnp.pad(xv, ((0, 0), (0, pad_h), (0, pad_w), (0, 0)))
    x0 = xv[:, 0::2, 0::2, :]
    x1 = xv[:, 1::2, 0::2, :]
    x2 = xv[:, 0::2, 1::2, :]
    x3 = xv[:, 1::2, 1::2, :]
    y = jnp.concatenate([x0, x1, x2, x3], axis=-1).reshape(B, -1, 4 * C)
    mean = jnp.mean(y, axis=-1, keepdims=True)
    var = jnp.mean((y - mean) ** 2, axis=-1, keepdims=True)
    yn = (y - mean) / jnp.sqrt(var + LN_EPS) * gamma + beta
    return jnp.einsum("blk,kn->bln", yn, w_red)


if __name__ == "__main__":
    key = jax.random.PRNGKey(0)
    kx, kw, kg, kb, kx2, kx3 = jax.random.split(key, 6)

    # Shared parameters: dim = C = 4 (nn.Linear(16, 8, bias=False), LayerNorm(16)).
    C = 4
    w_red = jax.random.normal(kw, (4 * C, 2 * C), dtype=jnp.float32) * 0.05
    gamma = 1.0 + 0.1 * jax.random.normal(kg, (4 * C,), dtype=jnp.float32)
    beta = 0.1 * jax.random.normal(kb, (4 * C,), dtype=jnp.float32)

    # Case 1: f32 activations, B=2, H=W=16  ->  x: (2, 256, 4)
    B, H, W = 2, 16, 16
    x = jax.random.normal(kx, (B, H * W, C), dtype=jnp.float32)
    out = jax.block_until_ready(patch_merging(x, H, W, w_red, gamma, beta))
    ref = _reference(x, H, W, w_red, gamma, beta)
    assert out.shape == (B, (H // 2) * (W // 2), 2 * C)
    assert out.dtype == x.dtype
    assert jnp.allclose(out, ref, atol=1e-4, rtol=1e-4)

    # Case 2: bf16 activations (bf16 HBM IO + bf16 MXU path), B=1, H=W=32.
    B2, H2, W2 = 1, 32, 32
    x_bf = jax.random.normal(kx2, (B2, H2 * W2, C), dtype=jnp.float32)
    x_bf = x_bf.astype(jnp.bfloat16)
    out_bf = jax.block_until_ready(patch_merging(x_bf, H2, W2, w_red, gamma, beta))
    ref_bf = _reference(x_bf, H2, W2, w_red, gamma, beta)
    assert out_bf.shape == (B2, (H2 // 2) * (W2 // 2), 2 * C)
    assert out_bf.dtype == jnp.bfloat16
    assert jnp.allclose(out_bf.astype(jnp.float32), ref_bf, atol=5e-2, rtol=5e-2)

    # Case 3: odd H (padding) + non-divisor grid (cdiv + partial/masked edge
    # block): B=3, H=13, W=16 -> Hp=14, Ho=7, Wo=8, R=21.  tm=64 forces a
    # multi-step grid whose last block is partial.
    B3, H3, W3 = 3, 13, 16
    x3 = jax.random.normal(kx3, (B3, H3 * W3, C), dtype=jnp.float32)
    out3 = jax.block_until_ready(
        patch_merging(x3, H3, W3, w_red, gamma, beta, tm=64))
    ref3 = _reference(x3, H3, W3, w_red, gamma, beta)
    assert out3.shape == (B3, ((H3 + 1) // 2) * (W3 // 2), 2 * C)
    assert jnp.allclose(out3, ref3, atol=1e-4, rtol=1e-4)

    print("KERNEL_OK")
</pallas_src>

<mosaic_0001>
module attributes {stable_mosaic.version = 11 : i64} {
  func.func @kernel(%arg0: i32, %arg1: memref<8x2x8x8xf32, #tpu.memory_space<vmem>>, %arg2: memref<8x8xf32, #tpu.memory_space<vmem>>, %arg3: memref<8x8xf32, #tpu.memory_space<vmem>>, %arg4: memref<1x8xf32, #tpu.memory_space<vmem>>, %arg5: memref<64x8xf32, #tpu.memory_space<vmem>>) attributes {dimension_semantics = [#tpu.dimension_semantics<parallel>], iteration_bounds = array<i64: 2>, scalar_prefetch = 0 : i64, scratch_operands = 0 : i64, tpu.core_type = #tpu.core_type<tc>, window_params = [{pipeline_mode = #tpu.pipeline_mode<double_buffered>, transform_indices = @transform_0, window_bounds = array<i64: 8, 2, 8, 8>}, {pipeline_mode = #tpu.pipeline_mode<synchronous>, transform_indices = @transform_1, window_bounds = array<i64: 8, 8>}, {pipeline_mode = #tpu.pipeline_mode<synchronous>, transform_indices = @transform_2, window_bounds = array<i64: 8, 8>}, {pipeline_mode = #tpu.pipeline_mode<synchronous>, transform_indices = @transform_3, window_bounds = array<i64: 1, 8>}, {transform_indices = @transform_4, window_bounds = array<i64: 64, 8>}]} {
    %c0 = arith.constant 0 : index
    %c0_0 = arith.constant 0 : index
    %c0_1 = arith.constant 0 : index
    %c0_2 = arith.constant 0 : index
    %0 = vector.load %arg1[%c0, %c0_0, %c0_1, %c0_2] : memref<8x2x8x8xf32, #tpu.memory_space<vmem>>, vector<8x1x8x8xf32>
    %1 = vector.shape_cast %0 : vector<8x1x8x8xf32> to vector<8x8x8xf32>
    %2 = vector.shape_cast %1 : vector<8x8x8xf32> to vector<64x8xf32>
    %c0_3 = arith.constant 0 : index
    %c1 = arith.constant 1 : index
    %c0_4 = arith.constant 0 : index
    %c0_5 = arith.constant 0 : index
    %3 = vector.load %arg1[%c0_3, %c1, %c0_4, %c0_5] : memref<8x2x8x8xf32, #tpu.memory_space<vmem>>, vector<8x1x8x8xf32>
    %4 = vector.shape_cast %3 : vector<8x1x8x8xf32> to vector<8x8x8xf32>
    %5 = vector.shape_cast %4 : vector<8x8x8xf32> to vector<64x8xf32>
    %cst = arith.constant dense<0.000000e+00> : vector<64xf32>
    %6 = vector.multi_reduction <add>, %2, %cst [1] : vector<64x8xf32> to vector<64xf32>
    %7 = vector.shape_cast %6 : vector<64xf32> to vector<64x1xf32>
    %cst_6 = arith.constant dense<0.000000e+00> : vector<64xf32>
    %8 = vector.multi_reduction <add>, %5, %cst_6 [1] : vector<64x8xf32> to vector<64xf32>
    %9 = vector.shape_cast %8 : vector<64xf32> to vector<64x1xf32>
    %10 = arith.addf %7, %9 : vector<64x1xf32>
    %cst_7 = arith.constant 6.250000e-02 : f32
    %11 = vector.broadcast %cst_7 : f32 to vector<64x1xf32>
    %12 = arith.mulf %10, %11 : vector<64x1xf32>
    %13 = vector.broadcast %12 : vector<64x1xf32> to vector<64x8xf32>
    %14 = arith.subf %2, %13 : vector<64x8xf32>
    %15 = vector.broadcast %12 : vector<64x1xf32> to vector<64x8xf32>
    %16 = arith.subf %5, %15 : vector<64x8xf32>
    %17 = arith.mulf %14, %14 : vector<64x8xf32>
    %cst_8 = arith.constant dense<0.000000e+00> : vector<64xf32>
    %18 = vector.multi_reduction <add>, %17, %cst_8 [1] : vector<64x8xf32> to vector<64xf32>
    %19 = vector.shape_cast %18 : vector<64xf32> to vector<64x1xf32>
    %20 = arith.mulf %16, %16 : vector<64x8xf32>
    %cst_9 = arith.constant dense<0.000000e+00> : vector<64xf32>
    %21 = vector.multi_reduction <add>, %20, %cst_9 [1] : vector<64x8xf32> to vector<64xf32>
    %22 = vector.shape_cast %21 : vector<64xf32> to vector<64x1xf32>
    %23 = arith.addf %19, %22 : vector<64x1xf32>
    %cst_10 = arith.constant 6.250000e-02 : f32
    %24 = vector.broadcast %cst_10 : f32 to vector<64x1xf32>
    %25 = arith.mulf %23, %24 : vector<64x1xf32>
    %cst_11 = arith.constant 9.99999974E-6 : f32
    %26 = vector.broadcast %cst_11 : f32 to vector<64x1xf32>
    %27 = arith.addf %25, %26 : vector<64x1xf32>
    %28 = math.rsqrt %27 : vector<64x1xf32>
    %29 = vector.broadcast %28 : vector<64x1xf32> to vector<64x8xf32>
    %30 = arith.mulf %14, %29 : vector<64x8xf32>
    %31 = vector.broadcast %28 : vector<64x1xf32> to vector<64x8xf32>
    %32 = arith.mulf %16, %31 : vector<64x8xf32>
    %c0_12 = arith.constant 0 : index
    %c0_13 = arith.constant 0 : index
    %33 = vector.load %arg2[%c0_12, %c0_13] : memref<8x8xf32, #tpu.memory_space<vmem>>, vector<8x8xf32>
    %cst_14 = arith.constant dense<0.000000e+00> : vector<64x8xf32>
    %34 = tpu.matmul %30, %33, %cst_14 {dimension_numbers = #tpu.dot_dimension_numbers<[1], [0], [0], [1], [0, 0, 1, 1], [], []>} : vector<64x8xf32>, vector<8x8xf32>, vector<64x8xf32> -> vector<64x8xf32>
    %c0_15 = arith.constant 0 : index
    %c0_16 = arith.constant 0 : index
    %35 = vector.load %arg3[%c0_15, %c0_16] : memref<8x8xf32, #tpu.memory_space<vmem>>, vector<8x8xf32>
    %cst_17 = arith.constant dense<0.000000e+00> : vector<64x8xf32>
    %36 = tpu.matmul %32, %35, %cst_17 {dimension_numbers = #tpu.dot_dimension_numbers<[1], [0], [0], [1], [0, 0, 1, 1], [], []>} : vector<64x8xf32>, vector<8x8xf32>, vector<64x8xf32> -> vector<64x8xf32>
    %37 = arith.addf %34, %36 : vector<64x8xf32>
    %c0_18 = arith.constant 0 : index
    %c0_19 = arith.constant 0 : index
    %38 = vector.load %arg4[%c0_18, %c0_19] : memref<1x8xf32, #tpu.memory_space<vmem>>, vector<1x8xf32>
    %39 = vector.broadcast %38 : vector<1x8xf32> to vector<64x8xf32>
    %40 = arith.addf %37, %39 : vector<64x8xf32>
    %c0_20 = arith.constant 0 : index
    %c0_21 = arith.constant 0 : index
    %41 = vector.load %arg5[%c0_20, %c0_21] : memref<64x8xf32, #tpu.memory_space<vmem>>, vector<64x8xf32>
    tpu.vector_store %arg5[%c0_20, %c0_21], %40 {strides = array<i32>} : memref<64x8xf32, #tpu.memory_space<vmem>>, vector<64x8xf32>,
    return
  }
  func.func @transform_0(%arg0: i32) -> (i32, i32, i32, i32) {
    %c0_i32 = arith.constant 0 : i32
    %c0_i32_0 = arith.constant 0 : i32
    %c0_i32_1 = arith.constant 0 : i32
    %c0_i32_2 = arith.constant 0 : i32
    return %arg0, %c0_i32, %c0_i32_0, %c0_i32_1 : i32, i32, i32, i32
  }
  func.func @transform_1(%arg0: i32) -> (i32, i32) {
    %c0_i32 = arith.constant 0 : i32
    %c0_i32_0 = arith.constant 0 : i32
    %c0_i32_1 = arith.constant 0 : i32
    return %c0_i32, %c0_i32_0 : i32, i32
  }
  func.func @transform_2(%arg0: i32) -> (i32, i32) {
    %c0_i32 = arith.constant 0 : i32
    %c0_i32_0 = arith.constant 0 : i32
    %c0_i32_1 = arith.constant 0 : i32
    return %c0_i32, %c0_i32_0 : i32, i32
  }
  func.func @transform_3(%arg0: i32) -> (i32, i32) {
    %c0_i32 = arith.constant 0 : i32
    %c0_i32_0 = arith.constant 0 : i32
    %c0_i32_1 = arith.constant 0 : i32
    return %c0_i32, %c0_i32_0 : i32, i32
  }
  func.func @transform_4(%arg0: i32) -> (i32, i32) {
    %c0_i32 = arith.constant 0 : i32
    %c0_i32_0 = arith.constant 0 : i32
    return %arg0, %c0_i32 : i32, i32
  }
}

</mosaic_0001>

<bundles_post_ra>
// kernel: patch_merging.1
= control target key start
LH: loop header
LB: loop body
LE: loop exit
PB: predicated region body
PF: predicated region fallthrough
CT: control target
= control target key end

     0   :  { %s902_s15 = smov 0   ;;  %s1140_s0 = inlined_call_operand.vmem [shape: f32[16,2,8,8], index: 0, kind: input, shape index: {}]   ;;  %s1141_s1 = inlined_call_operand.vmem [shape: f32[8,8], index: 1, kind: input, shape index: {}]   ;;  %s1142_s2 = inlined_call_operand.vmem [shape: f32[8,8], index: 2, kind: input, shape index: {}]   ;;  %s1143_s3 = inlined_call_operand.vmem [shape: f32[1,8], index: 3, kind: input, shape index: {}]   ;;  %s1144_s4 = inlined_call_operand.vmem [shape: f32[128,8], index: 4, kind: output, shape index: {}]  }
   0x1 LB: > { %s753_s16 = sadd.s32 4294967295, %s875_s15   ;;  %p757_p0 = scmp.ge.s32.totalorder %s875_s15, 1  ;;  %s875_s15 = sphi %s902_s15, %s14_s15  }
   0x2   : > { %p164_p1 = scmp.lt.s32.totalorder %s875_s15, 3 }
   0x4   : > { %p165_p2 = pnand %p757_p0, %p164_p1 }
   0x5   : > { %s758_s17 = sshll.u32 (!%p165_p2), %s753_s16, 3  ;;  %vm221_vm0 = vcmask (!%p165_p2), 64512  }
   0x6   : > { %168 = sbr.rel (%p165_p2) target bundleno = 580 (0x244), region = 36  ;;  %p192_p3 = scmp.lt.s32.totalorder (!%p165_p2), %s758_s17, 15 }
   0xd   : > { %s1146_s17 = smov (!%p192_p3, %s758_s17), 15 }
   0xe   : > { %s790_s18 = sshll.u32 %s1146_s17, 4  ;;  %s762_s26 = sshll.u32 %s1146_s17, 3 }
   0xf   : > { %s916_s21 = scalar_lea.vmem %s1140_s0, %s790_s18  ;;  %s1119_s5 = scalar_lea.vmem %s1144_s4, %s762_s26 }
  0x10   : > { %v205_v0 = vld [vmem:[%s916_s21 + $0x10] sm:$0xff]  ;;  %v204_v1 = vld [vmem:[%s916_s21] sm:$0xff]  ;;  %v764_v2 = vld [vmem:[%s916_s21 + $0x18] sm:$0xff] }
  0x11   : > { %v225_v3 = vsel %vm221_vm0, %v205_v0, 0.0  ;;  %v222_v4 = vsel %vm221_vm0, %v204_v1, 0.0  ;;  %v763_v5 = vld [vmem:[%s916_s21 + $0x8] sm:$0xff]  ;;  %v249_v6 = vsel %vm221_vm0, %v764_v2, 0.0  ;;  %v206_v9 = vld [vmem:[%s916_s21 + $0x20] sm:$0xff]  ;;  %v934_v12 = vld [vmem:[%s916_s21 + $0x38] sm:$0xff] }
  0x12   : > { %226 = vadd.xlane.f32.xlu1 %v225_v3  ;;  %223 = vadd.xlane.f32.xlu0 %v222_v4  ;;  %v246_v7 = vsel %vm221_vm0, %v763_v5, 0.0  ;;  %v927_v8 = vld [vmem:[%s916_s21 + $0x28] sm:$0xff]  ;;  %v228_v11 = vsel %vm221_vm0, %v206_v9, 0.0  ;;  %v937_v13 = vld [vmem:[%s916_s21 + $0x30] sm:$0xff]  ;;  %v255_v14 = vsel %vm221_vm0, %v934_v12, 0.0  ;;  %v947_v17 = vld [vmem:[%s916_s21 + $0x40] sm:$0xff] }
  0x13   : > { %v252_v10 = vsel %vm221_vm0, %v927_v8, 0.0  ;;  %v231_v15 = vsel %vm221_vm0, %v937_v13, 0.0  ;;  %v944_v16 = vld [vmem:[%s916_s21 + $0x48] sm:$0xff]  ;;  %v234_v19 = vsel %vm221_vm0, %v947_v17, 0.0  ;;  %v954_v20 = vld [vmem:[%s916_s21 + $0x58] sm:$0xff]  ;;  %v957_v21 = vld [vmem:[%s916_s21 + $0x50] sm:$0xff] }
  0x14   : > { %v258_v18 = vsel %vm221_vm0, %v944_v16, 0.0  ;;  %v261_v22 = vsel %vm221_vm0, %v954_v20, 0.0  ;;  %v237_v23 = vsel %vm221_vm0, %v957_v21, 0.0  ;;  %v964_v24 = vld [vmem:[%s916_s21 + $0x68] sm:$0xff]  ;;  %v967_v25 = vld [vmem:[%s916_s21 + $0x60] sm:$0xff]  ;;  %v974_v28 = vld [vmem:[%s916_s21 + $0x78] sm:$0xff] }
  0x15   : > { %v264_v26 = vsel %vm221_vm0, %v964_v24, 0.0  ;;  %v240_v27 = vsel %vm221_vm0, %v967_v25, 0.0  ;;  %v977_v29 = vld [vmem:[%s916_s21 + $0x70] sm:$0xff]  ;;  %v267_v30 = vsel %vm221_vm0, %v974_v28, 0.0 }
  0x16   : > { %250 = vadd.xlane.f32.xlu1 %v249_v6  ;;  %247 = vadd.xlane.f32.xlu0 %v246_v7  ;;  %v243_v31 = vsel %vm221_vm0, %v977_v29, 0.0 }
  0x1a   : > { %253 = vadd.xlane.f32.xlu1 %v252_v10  ;;  %229 = vadd.xlane.f32.xlu0 %v228_v11 }
  0x1e   : > { %256 = vadd.xlane.f32.xlu1 %v255_v14  ;;  %232 = vadd.xlane.f32.xlu0 %v231_v15 }
  0x22   : > { %259 = vadd.xlane.f32.xlu1 %v258_v18  ;;  %235 = vadd.xlane.f32.xlu0 %v234_v19 }
  0x26   : > { %262 = vadd.xlane.f32.xlu1 %v261_v22  ;;  %238 = vadd.xlane.f32.xlu0 %v237_v23 }
  0x2a   : > { %265 = vadd.xlane.f32.xlu1 %v264_v26  ;;  %241 = vadd.xlane.f32.xlu0 %v240_v27 }
  0x2e   : > { %268 = vadd.xlane.f32.xlu1 %v267_v30  ;;  %244 = vadd.xlane.f32.xlu0 %v243_v31 }
  0x9f   : > { %v227_v32 = vpop.xlane.xlu1 %226  ;;  %v224_v33 = vpop.xlane.xlu0 %223 }
  0xa3   : > { %v251_v34 = vpop.xlane.xlu1 %250  ;;  %v248_v35 = vpop.xlane.xlu0 %247 }
  0xa4   : > { %v271_v36 = vadd.f32 %v251_v34, %v227_v32  ;;  %v270_v37 = vadd.f32 %v248_v35, %v224_v33 }
  0xa6   : > { %v279_v38 = vmul.f32 0.0625, %v271_v36  ;;  %v278_v39 = vmul.f32 0.0625, %v270_v37 }
  0xa7   : > { %v254_v40 = vpop.xlane.xlu1 %253  ;;  %v230_v41 = vpop.xlane.xlu0 %229 }
  0xa8   : > { %v983_v42 = vsub.f32 %v205_v0, %v279_v38  ;;  %v985_v43 = vsub.f32 %v764_v2, %v279_v38  ;;  %v987_v44 = vsub.f32 %v204_v1, %v278_v39  ;;  %v989_v45 = vsub.f32 %v763_v5, %v278_v39 }
  0xa9   : > { %v272_v46 = vadd.f32 %v254_v40, %v230_v41 }
  0xaa   : > { %v334_v47 = vmul.f32 %v989_v45, %v989_v45  ;;  %v302_v48 = vmul.f32 %v987_v44, %v987_v44  ;;  %v335_v52 = vmul.f32 %v985_v43, %v985_v43  ;;  %v303_v56 = vmul.f32 %v983_v42, %v983_v42 }
  0xab   : > { %v280_v49 = vmul.f32 0.0625, %v272_v46  ;;  %v257_v50 = vpop.xlane.xlu1 %256  ;;  %v233_v51 = vpop.xlane.xlu0 %232 }
  0xac   : > { %v342_v53 = vsel %vm221_vm0, %v334_v47, 0.0  ;;  %v310_v54 = vsel %vm221_vm0, %v302_v48, 0.0  ;;  %v273_v55 = vadd.f32 %v257_v50, %v233_v51  ;;  %v345_v60 = vsel %vm221_vm0, %v335_v52, 0.0 }
  0xad   : > { %v1001_v57 = vsub.f32 %v206_v9, %v280_v49  ;;  %v1004_v58 = vsub.f32 %v927_v8, %v280_v49  ;;  %343 = vadd.xlane.f32.xlu1 %v342_v53  ;;  %311 = vadd.xlane.f32.xlu0 %v310_v54  ;;  %v313_v3 = vsel %vm221_vm0, %v303_v56, 0.0  ;;  %v414_v53 = vld [vmem:[%s1141_s1] sm:$0xff] }
  0xae   : > { %v281_v59 = vmul.f32 0.0625, %v273_v55  ;;  %823 = vmatprep.subr.mxu0 %v414_v53 }
  0xaf   : > { %v260_v61 = vpop.xlane.xlu1 %259  ;;  %v236_v62 = vpop.xlane.xlu0 %235  ;;  %v336_v63 = vmul.f32 %v1004_v58, %v1004_v58  ;;  %v304_v0 = vmul.f32 %v1001_v57, %v1001_v57  ;;  %824 = vmatpush3.msra.mxu0 %v414_v53 }
  0xb0   : > { %v1012_v1 = vsub.f32 %v937_v13, %v281_v59  ;;  %v1015_v2 = vsub.f32 %v934_v12, %v281_v59  ;;  %v274_v4 = vadd.f32 %v260_v61, %v236_v62 }
  0xb1   : > { %346 = vadd.xlane.f32.xlu1 %v345_v60  ;;  %314 = vadd.xlane.f32.xlu0 %v313_v3  ;;  %v348_v5 = vsel %vm221_vm0, %v336_v63, 0.0  ;;  %v316_v7 = vsel %vm221_vm0, %v304_v0, 0.0 }
  0xb2   : > { %v282_v6 = vmul.f32 0.0625, %v274_v4  ;;  %v337_v8 = vmul.f32 %v1015_v2, %v1015_v2  ;;  %v305_v9 = vmul.f32 %v1012_v1, %v1012_v1 }
  0xb3   : > { %v263_v10 = vpop.xlane.xlu1 %262  ;;  %v239_v11 = vpop.xlane.xlu0 %238 }
  0xb4   : > { %v1025_v12 = vsub.f32 %v947_v17, %v282_v6  ;;  %v1028_v13 = vsub.f32 %v944_v16, %v282_v6  ;;  %v275_v14 = vadd.f32 %v263_v10, %v239_v11  ;;  %v351_v15 = vsel %vm221_vm0, %v337_v8, 0.0 }
  0xb5   : > { %349 = vadd.xlane.f32.xlu1 %v348_v5  ;;  %317 = vadd.xlane.f32.xlu0 %v316_v7  ;;  %v319_v19 = vsel %vm221_vm0, %v305_v9, 0.0 }
  0xb6   : > { %v283_v18 = vmul.f32 0.0625, %v275_v14  ;;  %v338_v22 = vmul.f32 %v1028_v13, %v1028_v13  ;;  %v306_v23 = vmul.f32 %v1025_v12, %v1025_v12 }
  0xb7   : > { %v266_v26 = vpop.xlane.xlu1 %265  ;;  %v242_v17 = vpop.xlane.xlu0 %241 }
  0xb8   : > { %v1037_v27 = vsub.f32 %v957_v21, %v283_v18  ;;  %v1040_v16 = vsub.f32 %v954_v20, %v283_v18  ;;  %v276_v30 = vadd.f32 %v266_v26, %v242_v17  ;;  %v354_v31 = vsel %vm221_vm0, %v338_v22, 0.0 }
  0xb9   : > { %352 = vadd.xlane.f32.xlu1 %v351_v15  ;;  %320 = vadd.xlane.f32.xlu0 %v319_v19  ;;  %v322_v33 = vsel %vm221_vm0, %v306_v23, 0.0 }
  0xba   : > { %v284_v32 = vmul.f32 0.0625, %v276_v30  ;;  %v339_v34 = vmul.f32 %v1040_v16, %v1040_v16  ;;  %v307_v35 = vmul.f32 %v1037_v27, %v1037_v27 }
  0xbb   : > { %v269_v36 = vpop.xlane.xlu1 %268  ;;  %v245_v21 = vpop.xlane.xlu0 %244 }
  0xbc   : > { %v1049_v37 = vsub.f32 %v967_v25, %v284_v32  ;;  %v1052_v20 = vsub.f32 %v964_v24, %v284_v32  ;;  %v277_v38 = vadd.f32 %v269_v36, %v245_v21  ;;  %v357_v39 = vsel %vm221_vm0, %v339_v34, 0.0 }
  0xbd   : > { %355 = vadd.xlane.f32.xlu1 %v354_v31  ;;  %323 = vadd.xlane.f32.xlu0 %v322_v33  ;;  %v325_v41 = vsel %vm221_vm0, %v307_v35, 0.0 }
  0xbe   : > { %v285_v40 = vmul.f32 0.0625, %v277_v38  ;;  %v340_v46 = vmul.f32 %v1052_v20, %v1052_v20  ;;  %v308_v47 = vmul.f32 %v1049_v37, %v1049_v37 }
  0xc0   : > { %v1061_v25 = vsub.f32 %v977_v29, %v285_v40  ;;  %v1064_v24 = vsub.f32 %v974_v28, %v285_v40  ;;  %v360_v48 = vsel %vm221_vm0, %v340_v46, 0.0  ;;  %v328_v49 = vsel %vm221_vm0, %v308_v47, 0.0  ;;  %v415_v28 = vld [vmem:[%s1142_s2] sm:$0xff] }
  0xc1   : > { %358 = vadd.xlane.f32.xlu1 %v357_v39  ;;  %326 = vadd.xlane.f32.xlu0 %v325_v41 }
  0xc2   : > { %v341_v50 = vmul.f32 %v1064_v24, %v1064_v24  ;;  %v309_v51 = vmul.f32 %v1061_v25, %v1061_v25  ;;  %809 = vmatprep.subr.mxu1 %v415_v28 }
  0xc3   : > { %810 = vmatpush3.msra.mxu1 %v415_v28 }
  0xc4   : > { %v363_v29 = vsel %vm221_vm0, %v341_v50, 0.0  ;;  %v331_v52 = vsel %vm221_vm0, %v309_v51, 0.0 }
  0xc5   : > { %361 = vadd.xlane.f32.xlu1 %v360_v48  ;;  %329 = vadd.xlane.f32.xlu0 %v328_v49 }
  0xc9   : > { %364 = vadd.xlane.f32.xlu1 %v363_v29  ;;  %332 = vadd.xlane.f32.xlu0 %v331_v52 }
 0x13a   : > { %v344_v54 = vpop.xlane.xlu1 %343  ;;  %v312_v55 = vpop.xlane.xlu0 %311 }
 0x13b   : > { %v366_v56 = vadd.f32 %v344_v54, %v312_v55 }
 0x13d   : > { %v374_v59 = vmul.f32 0.0625, %v366_v56 }
 0x13e   : > { %v347_v60 = vpop.xlane.xlu1 %346  ;;  %v315_v61 = vpop.xlane.xlu0 %314 }
 0x13f   : > { %v382_v62 = vadd.f32 1e-05, %v374_v59  ;;  %v367_v63 = vadd.f32 %v347_v60, %v315_v61 }
 0x141   : > { %853 = vrsqrt.f32 %v382_v62  ;;  %v375_v0 = vmul.f32 0.0625, %v367_v63 }
 0x142   : > { %v350_v3 = vpop.xlane.xlu1 %349  ;;  %v318_v4 = vpop.xlane.xlu0 %317 }
 0x143   : > { %v383_v5 = vadd.f32 1e-05, %v375_v0  ;;  %v368_v6 = vadd.f32 %v350_v3, %v318_v4 }
 0x145   : > { %855 = vrsqrt.f32 %v383_v5  ;;  %v376_v7 = vmul.f32 0.0625, %v368_v6 }
 0x146   : > { %v353_v8 = vpop.xlane.xlu1 %352  ;;  %v321_v9 = vpop.xlane.xlu0 %320 }
 0x147   : > { %v384_v10 = vadd.f32 1e-05, %v376_v7  ;;  %v369_v11 = vadd.f32 %v353_v8, %v321_v9 }
 0x149   : > { %857 = vrsqrt.f32 %v384_v10  ;;  %v377_v14 = vmul.f32 0.0625, %v369_v11 }
 0x14a   : > { %v356_v15 = vpop.xlane.xlu1 %355  ;;  %v324_v18 = vpop.xlane.xlu0 %323 }
 0x14b   : > { %v854_v19 = vpop.eup %853  ;;  %v385_v22 = vadd.f32 1e-05, %v377_v14  ;;  %v370_v23 = vadd.f32 %v356_v15, %v324_v18 }
 0x14c   : > { %v406_v26 = vmul.f32 %v854_v19, %v989_v45  ;;  %v398_v17 = vmul.f32 %v854_v19, %v987_v44 }
 0x14d   : > { %859 = vrsqrt.f32 %v385_v22  ;;  %v378_v30 = vmul.f32 0.0625, %v370_v23 }
 0x14e   : > { %v359_v31 = vpop.xlane.xlu1 %358  ;;  %811 = vmatprep.mubr.msk.f32.mxu1 %vm221_vm0, %v406_v26  ;;  %825 = vmatprep.mubr.msk.f32.mxu0 %vm221_vm0, %v398_v17  ;;  %v327_v32 = vpop.xlane.xlu0 %326 }
 0x14f   : > { %v856_v33 = vpop.eup %855  ;;  %v386_v34 = vadd.f32 1e-05, %v378_v30  ;;  %v371_v35 = vadd.f32 %v359_v31, %v327_v32 }
 0x150   : > { %v407_v36 = vmul.f32 %v856_v33, %v985_v43  ;;  %v399_v21 = vmul.f32 %v856_v33, %v983_v42 }
 0x151   : > { %861 = vrsqrt.f32 %v386_v34  ;;  %v379_v38 = vmul.f32 0.0625, %v371_v35 }
 0x152   : > { %v362_v45 = vpop.xlane.xlu1 %361  ;;  %812 = vmatmul.mubr.msk.f32.vlgmr.msra.gmra.mrb[0].mxu1 %vm221_vm0, %v407_v36  ;;  %826 = vmatmul.mubr.msk.f32.vlgmr.msra.gmra.mrb[0].mxu0 %vm221_vm0, %v399_v21  ;;  %v330_v44 = vpop.xlane.xlu0 %329 }
 0x153   : > { %v858_v39 = vpop.eup %857  ;;  %v387_v40 = vadd.f32 1e-05, %v379_v38  ;;  %v372_v41 = vadd.f32 %v362_v45, %v330_v44 }
 0x154   : > { %v408_v46 = vmul.f32 %v858_v39, %v1004_v58  ;;  %v400_v47 = vmul.f32 %v858_v39, %v1001_v57 }
 0x155   : > { %863 = vrsqrt.f32 %v387_v40  ;;  %v380_v48 = vmul.f32 0.0625, %v372_v41 }
 0x156   : > { %v365_v43 = vpop.xlane.xlu1 %364  ;;  %814 = vmatprep.mubr.msk.f32.mxu1 %vm221_vm0, %v408_v46  ;;  %828 = vmatprep.mubr.msk.f32.mxu0 %vm221_vm0, %v400_v47  ;;  %v333_v42 = vpop.xlane.xlu0 %332 }
 0x157   : > { %v860_v49 = vpop.eup %859  ;;  %v388_v50 = vadd.f32 1e-05, %v380_v48  ;;  %v373_v51 = vadd.f32 %v365_v43, %v333_v42 }
 0x158   : > { %v409_v29 = vmul.f32 %v860_v49, %v1015_v2  ;;  %v401_v52 = vmul.f32 %v860_v49, %v1012_v1 }
 0x159   : > { %865 = vrsqrt.f32 %v388_v50  ;;  %v381_v28 = vmul.f32 0.0625, %v373_v51 }
 0x15a   : > { %815 = vmatmul.mubr.msk.f32.gmra.mrb[2].mxu1 %vm221_vm0, %v409_v29  ;;  %829 = vmatmul.mubr.msk.f32.gmra.mrb[2].mxu0 %vm221_vm0, %v401_v52 }
 0x15b   : > { %v862_v57 = vpop.eup %861  ;;  %v389_v58 = vadd.f32 1e-05, %v381_v28 }
 0x15c   : > { %v410_v53 = vmul.f32 %v862_v57, %v1028_v13  ;;  %v402_v54 = vmul.f32 %v862_v57, %v1025_v12 }
 0x15d   : > { %867 = vrsqrt.f32 %v389_v58 }
 0x15e   : > { %817 = vmatprep.mubr.msk.f32.mxu1 %vm221_vm0, %v410_v53  ;;  %831 = vmatprep.mubr.msk.f32.mxu0 %vm221_vm0, %v402_v54 }
 0x15f   : > { %v864_v2 = vpop.eup %863 }
 0x160   : > { %v411_v1 = vmul.f32 %v864_v2, %v1040_v16  ;;  %v403_v55 = vmul.f32 %v864_v2, %v1037_v27 }
 0x162   : > { %818 = vmatmul.mubr.msk.f32.gmra.mrb[4].mxu1 %vm221_vm0, %v411_v1  ;;  %832 = vmatmul.mubr.msk.f32.gmra.mrb[4].mxu0 %vm221_vm0, %v403_v55 }
 0x163   : > { %v866_v56 = vpop.eup %865 }
 0x164   : > { %v412_v13 = vmul.f32 %v866_v56, %v1052_v20  ;;  %v404_v12 = vmul.f32 %v866_v56, %v1049_v37  ;;  %v787_v37 = vld [vmem:[%s1143_s3] ss:$0 sm:$0xff] }
 0x166   : > { %820 = vmatprep.mubr.msk.f32.mxu1 %vm221_vm0, %v412_v13  ;;  %834 = vmatprep.mubr.msk.f32.mxu0 %vm221_vm0, %v404_v12 }
 0x167   : > { %v868_v59 = vpop.eup %867 }
 0x168   : > { %v413_v60 = vmul.f32 %v868_v59, %v1064_v24  ;;  %v405_v16 = vmul.f32 %v868_v59, %v1061_v25 }
 0x16a   : > { %821 = vmatmul.mubr.msk.f32.gmra.mrb[6].mxu1 %vm221_vm0, %v413_v60  ;;  %835 = vmatmul.mubr.msk.f32.gmra.mrb[6].mxu0 %vm221_vm0, %v405_v16 }
 0x225   : > { %v813_v27 = vpop.f32.mrb[0].mxu1  ;;  %v827_v61 = vpop.f32.mrb[0].mxu0 }
 0x226   : > { %v641_v20 = vadd.f32 %v827_v61, %v813_v27  ;;  %v506_v62 = vpop.f32.mrb[1].mxu1  ;;  %v635_v63 = vpop.f32.mrb[1].mxu0 }
 0x227   : > { %v636_v25 = vadd.f32 %v635_v63, %v506_v62 }
 0x228   : > { %v682_v24 = vadd.f32 %v787_v37, %v641_v20 }
 0x229   : > { %v681_v0 = vadd.f32 %v787_v37, %v636_v25 }
 0x22a   : > { %690 = vst.msk [vmem:[%s1119_s5 + $0x8] sm:$0xff] %vm221_vm0, %v682_v24 }
 0x22b   : > { %689 = vst.msk [vmem:[%s1119_s5] sm:$0xff] %vm221_vm0, %v681_v0 }
 0x22d   : > { %v816_v3 = vpop.f32.mrb[2].mxu1  ;;  %v830_v4 = vpop.f32.mrb[2].mxu0 }
 0x22e   : > { %v651_v5 = vadd.f32 %v830_v4, %v816_v3  ;;  %v516_v6 = vpop.f32.mrb[3].mxu1  ;;  %v645_v7 = vpop.f32.mrb[3].mxu0 }
 0x22f   : > { %v646_v8 = vadd.f32 %v645_v7, %v516_v6 }
 0x230   : > { %v684_v9 = vadd.f32 %v787_v37, %v651_v5 }
 0x231   : > { %v683_v10 = vadd.f32 %v787_v37, %v646_v8 }
 0x232   : > { %692 = vst.msk [vmem:[%s1119_s5 + $0x18] sm:$0xff] %vm221_vm0, %v684_v9 }
 0x233   : > { %691 = vst.msk [vmem:[%s1119_s5 + $0x10] sm:$0xff] %vm221_vm0, %v683_v10 }
 0x235   : > { %v819_v11 = vpop.f32.mrb[4].mxu1  ;;  %v833_v14 = vpop.f32.mrb[4].mxu0 }
 0x236   : > { %v661_v15 = vadd.f32 %v833_v14, %v819_v11  ;;  %v526_v18 = vpop.f32.mrb[5].mxu1  ;;  %v655_v19 = vpop.f32.mrb[5].mxu0 }
 0x237   : > { %v656_v22 = vadd.f32 %v655_v19, %v526_v18 }
 0x238   : > { %v686_v23 = vadd.f32 %v787_v37, %v661_v15 }
 0x239   : > { %v685_v26 = vadd.f32 %v787_v37, %v656_v22 }
 0x23a   : > { %694 = vst.msk [vmem:[%s1119_s5 + $0x28] sm:$0xff] %vm221_vm0, %v686_v23 }
 0x23b   : > { %693 = vst.msk [vmem:[%s1119_s5 + $0x20] sm:$0xff] %vm221_vm0, %v685_v26 }
 0x23d   : > { %v822_v17 = vpop.f32.mrb[6].mxu1  ;;  %v836_v30 = vpop.f32.mrb[6].mxu0 }
 0x23e   : > { %v671_v31 = vadd.f32 %v836_v30, %v822_v17  ;;  %v536_v32 = vpop.f32.mrb[7].mxu1  ;;  %v665_v33 = vpop.f32.mrb[7].mxu0 }
 0x23f   : > { %v666_v34 = vadd.f32 %v665_v33, %v536_v32 }
 0x240   : > { %v688_v35 = vadd.f32 %v787_v37, %v671_v31 }
 0x241   : > { %v687_v36 = vadd.f32 %v787_v37, %v666_v34 }
 0x242   : > { %696 = vst.msk [vmem:[%s1119_s5 + $0x38] sm:$0xff] %vm221_vm0, %v688_v35 }
 0x243   : > { %695 = vst.msk [vmem:[%s1119_s5 + $0x30] sm:$0xff] %vm221_vm0, %v687_v36 }
 0x244 PF: > { %s14_s15 = sadd.s32 1, %s875_s15  }
 0x245   : > { %p11_p4 = scmp.ge.s32.totalorder %s14_s15, 4  }
 0x247   :  { %13 = sbr.rel (!%p11_p4) target bundleno = 1 (0x1), region = 67 }

</bundles_post_ra>
